<compile_context>
chip_gen: v5e
topology: v5e:2x2
jax: 0.10.0
libtpu: 0.0.40
codegen_flags: <defaults>
</compile_context>

<pallas_src>
import jax
import jax.numpy as jnp
from jax.experimental import pallas as pl
from jax.experimental.pallas import tpu as pltpu


def _ipow(u, n: int):
    """u**n for a positive Python int n via repeated squaring (trace-time unrolled)."""
    result = None
    base = u
    while n > 0:
        if n & 1:
            result = base if result is None else result * base
        n >>= 1
        if n:
            base = base * base
    return result


def _make_bell_kernel_intpow(c: float, inv_a: float, n2: int):
    """Fast path: dist^b == |t|^(2b) with 2b a small non-negative integer."""
    def kernel(x_ref, o_ref):
        x = x_ref[...].astype(jnp.float32)
        t = (x - c) * inv_a                      # (x - c) / a  (divide hoisted)
        if n2 == 0:
            p = jnp.ones_like(t)                 # dist^0 == 1 (incl. pow(0,0)=1, as torch)
        else:
            p = _ipow(jnp.abs(t), n2)            # (t^2)^b == |t|^(2b)
        o_ref[...] = (1.0 / (1.0 + p)).astype(o_ref.dtype)
    return kernel


def _make_bell_kernel_generic(c: float, inv_a: float, neg_b: float):
    """Generic path: 1/(1+dist^b) == 0.5*(tanh(-0.5*b*log(dist)) + 1)."""
    def kernel(x_ref, o_ref):
        x = x_ref[...].astype(jnp.float32)
        t = (x - c) * inv_a
        dist = t * t
        z = neg_b * jnp.log(dist)
        o_ref[...] = (0.5 * (jnp.tanh(0.5 * z) + 1.0)).astype(o_ref.dtype)
    return kernel


def bell_member_func(x: jax.Array, a: float, b: float, c: float,
                     *, lanes: int = 512, target_block_rows: int = 1024) -> jax.Array:
    """Generalized bell membership function, elementwise, via a Pallas TPU kernel.

    Accepts any input shape/float dtype; preserves the input dtype on output.
    """
    a = float(a)
    b = float(b)
    c = float(c)

    orig_shape = x.shape
    out_dtype = x.dtype if jnp.issubdtype(x.dtype, jnp.floating) else jnp.float32
    x = x.astype(out_dtype)                       # no-op for floating inputs

    total = int(x.size)
    x_flat = x.reshape(-1)

    rows = -(-total // lanes)
    pad = rows * lanes - total
    if pad:
        # Only in the ragged-lane case; at most lanes-1 extra elements.
        x_flat = jnp.pad(x_flat, (0, pad))
    x2d = x_flat.reshape(rows, lanes)

    # Block sizing: full row dim if it fits, otherwise 1024-row blocks (mult. of 8/16)
    # and a cdiv grid whose ragged tail block Pallas masks automatically.
    block_rows = rows if rows <= target_block_rows else target_block_rows
    grid = (pl.cdiv(rows, block_rows),)

    # Pick the kernel body based on compile-time b.
    n2 = 2.0 * b
    if n2 >= 0.0 and abs(n2 - round(n2)) < 1e-12 and round(n2) <= 64:
        kernel = _make_bell_kernel_intpow(c, 1.0 / a, int(round(n2)))
    else:
        kernel = _make_bell_kernel_generic(c, 1.0 / a, -b)

    y2d = pl.pallas_call(
        kernel,
        out_shape=jax.ShapeDtypeStruct((rows, lanes), out_dtype),
        grid_spec=pltpu.PrefetchScalarGridSpec(
            num_scalar_prefetch=0,
            grid=grid,
            in_specs=[pl.BlockSpec((block_rows, lanes), lambda i: (i, 0))],
            out_specs=pl.BlockSpec((block_rows, lanes), lambda i: (i, 0)),
        ),
        compiler_params=pltpu.CompilerParams(
            dimension_semantics=("parallel",),    # independent row blocks
        ),
    )(x2d)

    if pad:
        return y2d.reshape(-1)[:total].reshape(orig_shape)
    return y2d.reshape(orig_shape)


def bell_member_func_ref(x, a, b, c):
    """Pure-JAX reference following the torch formula exactly (computed in f32)."""
    xf = x.astype(jnp.float32)
    dist = jnp.power((xf - c) / a, 2)
    return 1.0 / (1.0 + jnp.power(dist, b))


if __name__ == "__main__":
    key = jax.random.PRNGKey(0)
    x = jax.random.normal(key, (2, 4, 16, 16), dtype=jnp.float32) * 3.0

    # 1) Fast path (2*b is a small integer), f32 input.
    a, b, c = 2.0, 1.5, 0.5
    y = jax.block_until_ready(bell_member_func(x, a, b, c))
    y_ref = bell_member_func_ref(x, a, b, c)
    assert y.shape == x.shape and y.dtype == x.dtype
    assert jnp.allclose(y, y_ref, atol=1e-5, rtol=1e-5), "fast-path mismatch vs reference"

    # 2) Generic log/tanh path (non-half-integer b), f32 input, ragged flat size.
    x2 = jax.random.normal(jax.random.PRNGKey(1), (7, 33), dtype=jnp.float32) * 2.0
    b2 = 1.37
    y2 = jax.block_until_ready(bell_member_func(x2, a, b2, c))
    y2_ref = bell_member_func_ref(x2, a, b2, c)
    assert y2.shape == x2.shape and y2.dtype == x2.dtype
    assert jnp.allclose(y2, y2_ref, atol=1e-5, rtol=1e-5), "generic-path mismatch vs reference"

    # 3) Dtype-preserving I/O: bf16 in -> bf16 out.
    x3 = x.astype(jnp.bfloat16)
    y3 = jax.block_until_ready(bell_member_func(x3, a, b, c))
    y3_ref = bell_member_func_ref(x3, a, b, c).astype(jnp.bfloat16)
    assert y3.dtype == jnp.bfloat16 and y3.shape == x3.shape
    assert jnp.allclose(y3.astype(jnp.float32), y3_ref.astype(jnp.float32),
                        atol=1e-2, rtol=1e-2), "bf16 mismatch vs reference"

    print("KERNEL_OK")
</pallas_src>

<mosaic_0001>
module attributes {stable_mosaic.version = 11 : i64} {
  func.func @kernel(%arg0: i32, %arg1: memref<4x512xf32, #tpu.memory_space<vmem>>, %arg2: memref<4x512xf32, #tpu.memory_space<vmem>>) attributes {dimension_semantics = [#tpu.dimension_semantics<parallel>], iteration_bounds = array<i64: 1>, scalar_prefetch = 0 : i64, scratch_operands = 0 : i64, tpu.core_type = #tpu.core_type<tc>, window_params = [{transform_indices = @transform_0, window_bounds = array<i64: 4, 512>}, {transform_indices = @transform_1, window_bounds = array<i64: 4, 512>}]} {
    %c0 = arith.constant 0 : index
    %c0_0 = arith.constant 0 : index
    %0 = vector.load %arg1[%c0, %c0_0] : memref<4x512xf32, #tpu.memory_space<vmem>>, vector<4x512xf32>
    %cst = arith.constant 5.000000e-01 : f32
    %1 = vector.broadcast %cst : f32 to vector<4x512xf32>
    %2 = arith.subf %0, %1 : vector<4x512xf32>
    %cst_1 = arith.constant 5.000000e-01 : f32
    %3 = vector.broadcast %cst_1 : f32 to vector<4x512xf32>
    %4 = arith.mulf %2, %3 : vector<4x512xf32>
    %5 = math.absf %4 : vector<4x512xf32>
    %6 = arith.mulf %5, %5 : vector<4x512xf32>
    %7 = arith.mulf %5, %6 : vector<4x512xf32>
    %cst_2 = arith.constant 1.000000e+00 : f32
    %8 = vector.broadcast %cst_2 : f32 to vector<4x512xf32>
    %9 = arith.addf %8, %7 : vector<4x512xf32>
    %cst_3 = arith.constant 1.000000e+00 : f32
    %10 = vector.broadcast %cst_3 : f32 to vector<4x512xf32>
    %11 = arith.divf %10, %9 : vector<4x512xf32>
    %c0_4 = arith.constant 0 : index
    %c0_5 = arith.constant 0 : index
    %12 = vector.load %arg2[%c0_4, %c0_5] : memref<4x512xf32, #tpu.memory_space<vmem>>, vector<4x512xf32>
    tpu.vector_store %arg2[%c0_4, %c0_5], %11 {strides = array<i32>} : memref<4x512xf32, #tpu.memory_space<vmem>>, vector<4x512xf32>,
    return
  }
  func.func @transform_0(%arg0: i32) -> (i32, i32) {
    %c0_i32 = arith.constant 0 : i32
    %c0_i32_0 = arith.constant 0 : i32
    return %arg0, %c0_i32 : i32, i32
  }
  func.func @transform_1(%arg0: i32) -> (i32, i32) {
    %c0_i32 = arith.constant 0 : i32
    %c0_i32_0 = arith.constant 0 : i32
    return %arg0, %c0_i32 : i32, i32
  }
}

</mosaic_0001>

<bundles_post_ra>
// kernel: tpu_custom_call.1
= control target key start
LH: loop header
LB: loop body
LE: loop exit
PB: predicated region body
PF: predicated region fallthrough
CT: control target
= control target key end

     0   :  { %6 = vsyncpa [#allocation3], 0  ;;  %s164_s0 = inlined_call_operand.hbm [shape: f32[4,512], index: 0, kind: input, shape index: {}]   ;;  %s165_s1 = inlined_call_operand.hbm [shape: f32[4,512], index: 1, kind: output, shape index: {}]  }
   0x1   :  { %7 = vsyncpa [#allocation4], 0  ;;  %s13_s8 = sshll.u32 %s164_s0, 4  ;;  %s146_s9 = smov [#allocation2]   ;;  %s14_s8 = int_to_ptr.hbm [resolvable:$true] %s13_s8 }
   0x2   :  { %s15_s10 = sshll.u32 %s146_s9, 4  ;;  %s16_s10 = int_to_ptr.vmem [resolvable:$true] %s15_s10 }
   0x3   :  { %18 = dma.hbm_to_vmem [thread:$0]  %s14_s8, 256, %s16_s10, [#allocation3]  }
   0x4   :  { %142 = dma.done.wait [#allocation3], 256  }
   0x5   :  { %143 = vsyncadd [#allocation3], 4294967040  ;;  %v23_v0 = vld [vmem:[#allocation2] sm:$0xff]  ;;  %v24_v1 = vld [vmem:[#allocation2 + $0x8] sm:$0xff]  ;;  %s147_s0 = smov [#allocation5]   ;;  %s76_s14 = sshll.u32 %s165_s1, 4  ;;  %s77_s14 = int_to_ptr.hbm [resolvable:$true] %s76_s14 }
   0x6   :  { %v86_v2 = vadd.f32 -0.5, %v23_v0  ;;  %v87_v3 = vadd.f32 -0.5, %v24_v1  ;;  %s74_s11 = sshll.u32 %s147_s0, 4  ;;  %s75_s11 = int_to_ptr.vmem [resolvable:$true] %s74_s11 }
   0x8   :  { %v27_v4 = vmul.f32 0.5, %v86_v2  ;;  %v28_v5 = vmul.f32 0.5, %v87_v3 }
   0xa   :  { %v29_v6 = vand.u32 2147483647, %v27_v4  ;;  %v30_v7 = vand.u32 2147483647, %v28_v5 }
   0xc   :  { %v31_v8 = vmul.f32 %v29_v6, %v29_v6  ;;  %v32_v9 = vmul.f32 %v30_v7, %v30_v7 }
   0xe   :  { %v33_v10 = vmul.f32 %v31_v8, %v29_v6  ;;  %v34_v11 = vmul.f32 %v32_v9, %v30_v7 }
  0x10   :  { %v35_v12 = vadd.f32 1.0, %v33_v10  ;;  %v36_v13 = vadd.f32 1.0, %v34_v11 }
  0x12   :  { %90 = vrcp.f32 %v35_v12  ;;  %vm42_vm0 = vweird.f32 %v35_v12  ;;  %v48_v17 = vand.u32 2147483648, %v35_v12  ;;  %v46_v20 = vand.u32 2147483647, %v35_v12 }
  0x13   :  { %92 = vrcp.f32 %v36_v13  ;;  %v63_v21 = vand.u32 2147483648, %v36_v13  ;;  %vm57_vm2 = vweird.f32 %v36_v13  ;;  %v61_v23 = vand.u32 2147483647, %v36_v13 }
  0x14   :  { %v49_v25 = vor.u32 1.1754944e-38, %v48_v17  ;;  %vm47_vm5 = vcmp.eq.f32.partialorder %v46_v20, 8.507059e+37 }
  0x15   :  { %v64_v28 = vor.u32 1.1754944e-38, %v63_v21  ;;  %vm62_vm7 = vcmp.eq.f32.partialorder %v61_v23, 8.507059e+37 }
  0x18   :  { %v91_v14 = vpop.eup %90 }
  0x19   :  { %v93_v15 = vpop.eup %92  ;;  %v38_v16 = vmul.f32 %v91_v14, %v35_v12  ;;  %vm43_vm1 = vweird.f32 %v91_v14 }
  0x1a   :  { %v53_v18 = vmul.f32 %v93_v15, %v36_v13  ;;  %vm58_vm3 = vweird.f32 %v93_v15  ;;  %vm44_vm4 = vmor %vm42_vm0, %vm43_vm1 }
  0x1b   :  { %v39_v19 = vsub.f32 1.0, %v38_v16  ;;  %vm59_vm6 = vmor %vm57_vm2, %vm58_vm3 }
  0x1c   :  { %v54_v22 = vsub.f32 1.0, %v53_v18 }
  0x1d   :  { %v40_v24 = vmul.f32 %v91_v14, %v39_v19 }
  0x1e   :  { %v55_v26 = vmul.f32 %v93_v15, %v54_v22 }
  0x1f   :  { %v41_v27 = vadd.f32 %v91_v14, %v40_v24 }
  0x20   :  { %v56_v29 = vadd.f32 %v93_v15, %v55_v26 }
  0x21   :  { %v45_v30 = vsel %vm44_vm4, %v91_v14, %v41_v27 }
  0x22   :  { %v50_v31 = vsel %vm47_vm5, %v49_v25, %v45_v30  ;;  %v60_v32 = vsel %vm59_vm6, %v93_v15, %v56_v29 }
  0x23   :  { %67 = vst [vmem:[#allocation5] sm:$0xff] %v50_v31  ;;  %v65_v33 = vsel %vm62_vm7, %v64_v28, %v60_v32 }
  0x24   :  { %68 = vst [vmem:[#allocation5 + $0x8] sm:$0xff] %v65_v33 }
  0x25   :  { %79 = dma.vmem_to_hbm [thread:$0]  %s75_s11, 256, %s77_s14, [#allocation4]  }
  0x26   :  { %144 = dma.done.wait [#allocation4], 256  }
  0x27   :  { %145 = vsyncadd [#allocation4], 4294967040 }
  0x28   :  { %84 = vsyncpa [#allocation3], 1 }
  0x29   :  { %85 = vsyncpa [#allocation4], 1 }

</bundles_post_ra>
